<compile_context>
chip_gen: v7x
topology: tpu7x:2x2x1
jax: 0.10.0
libtpu: 0.0.40
codegen_flags: <defaults>
</compile_context>

<pallas_src>
import functools
import math

import jax
import jax.numpy as jnp
from jax.experimental import pallas as pl
from jax.experimental.pallas import tpu as pltpu

_SUBLANE = 8      # f32 sublane packing
_MAX_TB = 1024    # max batch-tile rows (measured sweet spot for mem-bound tiling)


def _round_up(x, m):
    return ((x + m - 1) // m) * m


def _mlp_kernel(x_ref,
                w1_ref, b1_ref,
                w2_ref, b2_ref,
                w3_ref, b3_ref,
                w4_ref, b4_ref,
                o_ref,
                *, compute_dtype):
    """Fully fused 4-layer MLP on one (TB, in_size) batch tile.

    Matmuls run on the MXU in `compute_dtype` (bf16 default, f32 for exactness);
    accumulation, bias add and ReLU stay in f32.  Weights arrive already in
    `compute_dtype` (pre-cast once in the wrapper), so there is no per-step weight cast.
    """

    def dense(h, w_ref, b_ref, relu):
        lhs = h if h.dtype == compute_dtype else h.astype(compute_dtype)
        y = jnp.dot(lhs, w_ref[...], preferred_element_type=jnp.float32)
        y = y + b_ref[...]
        if relu:
            y = jnp.maximum(y, 0.0)
        return y

    h = x_ref[...]                               # cast (if any) happens once in dense()
    h = dense(h, w1_ref, b1_ref, relu=True)      # (TB, in)  @ (in, 32)
    h = dense(h, w2_ref, b2_ref, relu=True)      # (TB, 32)  @ (32, 128)
    h = dense(h, w3_ref, b3_ref, relu=True)      # (TB, 128) @ (128, 64)
    h = dense(h, w4_ref, b4_ref, relu=False)     # (TB, 64)  @ (64, out)
    o_ref[...] = h.astype(o_ref.dtype)


def _pick_batch_tile(B, block_b):
    if block_b is not None:
        tb = block_b
    else:
        # ~4+ grid steps (keeps both v7x TensorCores busy and the double-buffer
        # pipeline overlapped) with tiles capped at 1024 rows so per-step grid
        # overhead is amortized on large batches.
        tb = min(_MAX_TB, _round_up(pl.cdiv(B, 4), _SUBLANE))
    return max(_SUBLANE, _round_up(tb, _SUBLANE))


def neural_network_forward(x, params, *, block_b=None, use_bf16_matmul=True):
    """Fused MLP forward.

    x: (B, input_size) float32 (or bf16).
    params: dict with w1..w4 in (in_features, out_features) layout and b1..b4 of
            shape (1, out_features).
    use_bf16_matmul: bf16 MXU operands with f32 accumulation (default, fast path on
            all TPU generations).  Set False for the bit-exact f32 path.
    """
    B, in_size = x.shape
    out_size = params["w4"].shape[1]

    compute_dtype = jnp.bfloat16 if use_bf16_matmul else jnp.float32

    # Pre-cast the VMEM-resident weights ONCE here (tiny arrays), not per grid step
    # inside the kernel.  Biases stay f32 (bias/ReLU path is f32 either way).
    def _w(name):
        w = params[name]
        return w if w.dtype == compute_dtype else w.astype(compute_dtype)

    weights = (
        _w("w1"), params["b1"],
        _w("w2"), params["b2"],
        _w("w3"), params["b3"],
        _w("w4"), params["b4"],
    )

    tb = _pick_batch_tile(B, block_b)
    grid = (pl.cdiv(B, tb),)   # trailing partial batch block is masked by Pallas

    def _resident_spec(shape):
        # Full-array block, constant index map -> stays VMEM-resident, no re-DMA per step.
        zeros = (0,) * len(shape)                 # bound eagerly (no late-binding bug)
        return pl.BlockSpec(shape, lambda i, _z=zeros: _z)

    in_specs = [pl.BlockSpec((tb, in_size), lambda i: (i, 0))]
    in_specs += [_resident_spec(w.shape) for w in weights]
    # Output block last dim == out_size (full dim): no 128-lane zero pad, no wrapper
    # slice; only the real bytes are written back to HBM.
    out_spec = pl.BlockSpec((tb, out_size), lambda i: (i, 0))

    kernel = functools.partial(_mlp_kernel, compute_dtype=compute_dtype)

    return pl.pallas_call(
        kernel,
        out_shape=jax.ShapeDtypeStruct((B, out_size), jnp.float32),
        grid=grid,
        in_specs=in_specs,
        out_specs=out_spec,
        compiler_params=pltpu.CompilerParams(
            # Batch axis is embarrassingly parallel -> shard across v7x's 2 TensorCores.
            dimension_semantics=("parallel",),
        ),
    )(x, *weights)


def init_params(key, input_size, output_size):
    """Deterministic init mirroring PyTorch nn.Linear (uniform +/- 1/sqrt(fan_in)).

    Weights are stored transposed relative to PyTorch: (in_features, out_features).
    Biases are kept 2D (1, out_features) for TPU-friendly layout.
    """
    sizes = [(input_size, 32), (32, 128), (128, 64), (64, output_size)]
    params = {}
    for i, (fan_in, fan_out) in enumerate(sizes, start=1):
        key, kw, kb = jax.random.split(key, 3)
        bound = 1.0 / math.sqrt(fan_in)
        params[f"w{i}"] = jax.random.uniform(
            kw, (fan_in, fan_out), jnp.float32, minval=-bound, maxval=bound)
        params[f"b{i}"] = jax.random.uniform(
            kb, (1, fan_out), jnp.float32, minval=-bound, maxval=bound)
    return params


def reference_forward(x, params):
    """Plain-JAX reference for correctness check."""
    h = jnp.maximum(x @ params["w1"] + params["b1"], 0.0)
    h = jnp.maximum(h @ params["w2"] + params["b2"], 0.0)
    h = jnp.maximum(h @ params["w3"] + params["b3"], 0.0)
    return h @ params["w4"] + params["b4"]


if __name__ == "__main__":
    key = jax.random.PRNGKey(0)
    input_size = 8    # e.g. LunarLander state dim
    output_size = 4   # e.g. number of actions

    key, kx, kp, kx2, kx3 = jax.random.split(key, 5)
    params = init_params(kp, input_size, output_size)

    # --- Small-batch check, exact f32 MXU path (single masked block). ---
    batch = 2
    x = jax.random.normal(kx, (batch, input_size), jnp.float32)
    out = jax.block_until_ready(
        neural_network_forward(x, params, use_bf16_matmul=False))
    ref = reference_forward(x, params)
    assert out.shape == (batch, output_size)
    assert jnp.allclose(out, ref, atol=1e-5, rtol=1e-5), "f32 Pallas output mismatch vs reference"

    # --- Larger batch exercising the tiled grid (f32 exact path). ---
    big_batch = 512
    xb = jax.random.normal(kx2, (big_batch, input_size), jnp.float32)
    out_b = jax.block_until_ready(
        neural_network_forward(xb, params, use_bf16_matmul=False))
    ref_b = reference_forward(xb, params)
    assert out_b.shape == (big_batch, output_size)
    assert jnp.allclose(out_b, ref_b, atol=1e-5, rtol=1e-5), "tiled f32 output mismatch vs reference"

    # --- Ragged batch (not a multiple of the tile) -> trailing partial block masked. ---
    ragged_batch = 300
    xr = jax.random.normal(kx3, (ragged_batch, input_size), jnp.float32)
    out_r = jax.block_until_ready(
        neural_network_forward(xr, params, use_bf16_matmul=False))
    ref_r = reference_forward(xr, params)
    assert out_r.shape == (ragged_batch, output_size)
    assert jnp.allclose(out_r, ref_r, atol=1e-5, rtol=1e-5), "ragged-batch output mismatch vs reference"

    # --- Default bf16-MXU path (fast path on all generations), loose tolerance. ---
    out_bf16 = jax.block_until_ready(neural_network_forward(xb, params))
    assert out_bf16.shape == (big_batch, output_size)
    assert jnp.allclose(out_bf16, ref_b, atol=5e-2, rtol=5e-2), "bf16 output mismatch vs reference"

    print("KERNEL_OK")
</pallas_src>

<mosaic_0001>
module attributes {stable_mosaic.version = 11 : i64} {
  func.func @_mlp_kernel(%arg0: i32, %arg1: memref<8x8xf32, #tpu.memory_space<vmem>>, %arg2: memref<8x32xf32, #tpu.memory_space<vmem>>, %arg3: memref<1x32xf32, #tpu.memory_space<vmem>>, %arg4: memref<32x128xf32, #tpu.memory_space<vmem>>, %arg5: memref<1x128xf32, #tpu.memory_space<vmem>>, %arg6: memref<128x64xf32, #tpu.memory_space<vmem>>, %arg7: memref<1x64xf32, #tpu.memory_space<vmem>>, %arg8: memref<64x4xf32, #tpu.memory_space<vmem>>, %arg9: memref<1x4xf32, #tpu.memory_space<vmem>>, %arg10: memref<8x4xf32, #tpu.memory_space<vmem>>) attributes {dimension_semantics = [#tpu.dimension_semantics<parallel>], iteration_bounds = array<i64: 1>, scalar_prefetch = 0 : i64, scratch_operands = 0 : i64, tpu.core_type = #tpu.core_type<tc>, window_params = [{transform_indices = @transform_0, window_bounds = array<i64: 8, 8>}, {pipeline_mode = #tpu.pipeline_mode<synchronous>, transform_indices = @transform_1, window_bounds = array<i64: 8, 32>}, {pipeline_mode = #tpu.pipeline_mode<synchronous>, transform_indices = @transform_2, window_bounds = array<i64: 1, 32>}, {pipeline_mode = #tpu.pipeline_mode<synchronous>, transform_indices = @transform_3, window_bounds = array<i64: 32, 128>}, {pipeline_mode = #tpu.pipeline_mode<synchronous>, transform_indices = @transform_4, window_bounds = array<i64: 1, 128>}, {pipeline_mode = #tpu.pipeline_mode<synchronous>, transform_indices = @transform_5, window_bounds = array<i64: 128, 64>}, {pipeline_mode = #tpu.pipeline_mode<synchronous>, transform_indices = @transform_6, window_bounds = array<i64: 1, 64>}, {pipeline_mode = #tpu.pipeline_mode<synchronous>, transform_indices = @transform_7, window_bounds = array<i64: 64, 4>}, {pipeline_mode = #tpu.pipeline_mode<synchronous>, transform_indices = @transform_8, window_bounds = array<i64: 1, 4>}, {transform_indices = @transform_9, window_bounds = array<i64: 8, 4>}]} {
    %c0 = arith.constant 0 : index
    %c0_0 = arith.constant 0 : index
    %0 = vector.load %arg1[%c0, %c0_0] : memref<8x8xf32, #tpu.memory_space<vmem>>, vector<8x8xf32>
    %c0_1 = arith.constant 0 : index
    %c0_2 = arith.constant 0 : index
    %1 = vector.load %arg2[%c0_1, %c0_2] : memref<8x32xf32, #tpu.memory_space<vmem>>, vector<8x32xf32>
    %cst = arith.constant dense<0.000000e+00> : vector<8x32xf32>
    %2 = tpu.matmul %0, %1, %cst {dimension_numbers = #tpu.dot_dimension_numbers<[1], [0], [0], [1], [0, 0, 1, 1], [], []>} : vector<8x8xf32>, vector<8x32xf32>, vector<8x32xf32> -> vector<8x32xf32>
    %c0_3 = arith.constant 0 : index
    %c0_4 = arith.constant 0 : index
    %3 = vector.load %arg3[%c0_3, %c0_4] : memref<1x32xf32, #tpu.memory_space<vmem>>, vector<1x32xf32>
    %4 = vector.broadcast %3 : vector<1x32xf32> to vector<8x32xf32>
    %5 = arith.addf %2, %4 : vector<8x32xf32>
    %cst_5 = arith.constant 0.000000e+00 : f32
    %6 = vector.broadcast %cst_5 : f32 to vector<8x32xf32>
    %7 = arith.maximumf %5, %6 : vector<8x32xf32>
    %c0_6 = arith.constant 0 : index
    %c0_7 = arith.constant 0 : index
    %8 = vector.load %arg4[%c0_6, %c0_7] : memref<32x128xf32, #tpu.memory_space<vmem>>, vector<32x128xf32>
    %cst_8 = arith.constant dense<0.000000e+00> : vector<8x128xf32>
    %9 = tpu.matmul %7, %8, %cst_8 {dimension_numbers = #tpu.dot_dimension_numbers<[1], [0], [0], [1], [0, 0, 1, 1], [], []>} : vector<8x32xf32>, vector<32x128xf32>, vector<8x128xf32> -> vector<8x128xf32>
    %c0_9 = arith.constant 0 : index
    %c0_10 = arith.constant 0 : index
    %10 = vector.load %arg5[%c0_9, %c0_10] : memref<1x128xf32, #tpu.memory_space<vmem>>, vector<1x128xf32>
    %11 = vector.broadcast %10 : vector<1x128xf32> to vector<8x128xf32>
    %12 = arith.addf %9, %11 : vector<8x128xf32>
    %cst_11 = arith.constant 0.000000e+00 : f32
    %13 = vector.broadcast %cst_11 : f32 to vector<8x128xf32>
    %14 = arith.maximumf %12, %13 : vector<8x128xf32>
    %c0_12 = arith.constant 0 : index
    %c0_13 = arith.constant 0 : index
    %15 = vector.load %arg6[%c0_12, %c0_13] : memref<128x64xf32, #tpu.memory_space<vmem>>, vector<128x64xf32>
    %cst_14 = arith.constant dense<0.000000e+00> : vector<8x64xf32>
    %16 = tpu.matmul %14, %15, %cst_14 {dimension_numbers = #tpu.dot_dimension_numbers<[1], [0], [0], [1], [0, 0, 1, 1], [], []>} : vector<8x128xf32>, vector<128x64xf32>, vector<8x64xf32> -> vector<8x64xf32>
    %c0_15 = arith.constant 0 : index
    %c0_16 = arith.constant 0 : index
    %17 = vector.load %arg7[%c0_15, %c0_16] : memref<1x64xf32, #tpu.memory_space<vmem>>, vector<1x64xf32>
    %18 = vector.broadcast %17 : vector<1x64xf32> to vector<8x64xf32>
    %19 = arith.addf %16, %18 : vector<8x64xf32>
    %cst_17 = arith.constant 0.000000e+00 : f32
    %20 = vector.broadcast %cst_17 : f32 to vector<8x64xf32>
    %21 = arith.maximumf %19, %20 : vector<8x64xf32>
    %c0_18 = arith.constant 0 : index
    %c0_19 = arith.constant 0 : index
    %22 = vector.load %arg8[%c0_18, %c0_19] : memref<64x4xf32, #tpu.memory_space<vmem>>, vector<64x4xf32>
    %cst_20 = arith.constant dense<0.000000e+00> : vector<8x4xf32>
    %23 = tpu.matmul %21, %22, %cst_20 {dimension_numbers = #tpu.dot_dimension_numbers<[1], [0], [0], [1], [0, 0, 1, 1], [], []>} : vector<8x64xf32>, vector<64x4xf32>, vector<8x4xf32> -> vector<8x4xf32>
    %c0_21 = arith.constant 0 : index
    %c0_22 = arith.constant 0 : index
    %24 = vector.load %arg9[%c0_21, %c0_22] : memref<1x4xf32, #tpu.memory_space<vmem>>, vector<1x4xf32>
    %25 = vector.broadcast %24 : vector<1x4xf32> to vector<8x4xf32>
    %26 = arith.addf %23, %25 : vector<8x4xf32>
    %c0_23 = arith.constant 0 : index
    %c0_24 = arith.constant 0 : index
    %27 = vector.load %arg10[%c0_23, %c0_24] : memref<8x4xf32, #tpu.memory_space<vmem>>, vector<8x4xf32>
    tpu.vector_store %arg10[%c0_23, %c0_24], %26 {strides = array<i32>} : memref<8x4xf32, #tpu.memory_space<vmem>>, vector<8x4xf32>,
    return
  }
  func.func @transform_0(%arg0: i32) -> (i32, i32) {
    %c0_i32 = arith.constant 0 : i32
    %c0_i32_0 = arith.constant 0 : i32
    return %arg0, %c0_i32 : i32, i32
  }
  func.func @transform_1(%arg0: i32) -> (i32, i32) {
    %c0_i32 = arith.constant 0 : i32
    %c0_i32_0 = arith.constant 0 : i32
    %c0_i32_1 = arith.constant 0 : i32
    return %c0_i32, %c0_i32_0 : i32, i32
  }
  func.func @transform_2(%arg0: i32) -> (i32, i32) {
    %c0_i32 = arith.constant 0 : i32
    %c0_i32_0 = arith.constant 0 : i32
    %c0_i32_1 = arith.constant 0 : i32
    return %c0_i32, %c0_i32_0 : i32, i32
  }
  func.func @transform_3(%arg0: i32) -> (i32, i32) {
    %c0_i32 = arith.constant 0 : i32
    %c0_i32_0 = arith.constant 0 : i32
    %c0_i32_1 = arith.constant 0 : i32
    return %c0_i32, %c0_i32_0 : i32, i32
  }
  func.func @transform_4(%arg0: i32) -> (i32, i32) {
    %c0_i32 = arith.constant 0 : i32
    %c0_i32_0 = arith.constant 0 : i32
    %c0_i32_1 = arith.constant 0 : i32
    return %c0_i32, %c0_i32_0 : i32, i32
  }
  func.func @transform_5(%arg0: i32) -> (i32, i32) {
    %c0_i32 = arith.constant 0 : i32
    %c0_i32_0 = arith.constant 0 : i32
    %c0_i32_1 = arith.constant 0 : i32
    return %c0_i32, %c0_i32_0 : i32, i32
  }
  func.func @transform_6(%arg0: i32) -> (i32, i32) {
    %c0_i32 = arith.constant 0 : i32
    %c0_i32_0 = arith.constant 0 : i32
    %c0_i32_1 = arith.constant 0 : i32
    return %c0_i32, %c0_i32_0 : i32, i32
  }
  func.func @transform_7(%arg0: i32) -> (i32, i32) {
    %c0_i32 = arith.constant 0 : i32
    %c0_i32_0 = arith.constant 0 : i32
    %c0_i32_1 = arith.constant 0 : i32
    return %c0_i32, %c0_i32_0 : i32, i32
  }
  func.func @transform_8(%arg0: i32) -> (i32, i32) {
    %c0_i32 = arith.constant 0 : i32
    %c0_i32_0 = arith.constant 0 : i32
    %c0_i32_1 = arith.constant 0 : i32
    return %c0_i32, %c0_i32_0 : i32, i32
  }
  func.func @transform_9(%arg0: i32) -> (i32, i32) {
    %c0_i32 = arith.constant 0 : i32
    %c0_i32_0 = arith.constant 0 : i32
    return %arg0, %c0_i32 : i32, i32
  }
}

</mosaic_0001>

<bundles_post_ra>
// kernel: tpu_custom_call.1
= control target key start
LH: loop header
LB: loop body
LE: loop exit
PB: predicated region body
PF: predicated region fallthrough
CT: control target
= control target key end

     0   :  { %14 = vsyncpa [#allocation3], 0  ;;  %v586_v2 = vmov 0.0   ;;  %vm587_vm0 = vmmov 0   ;;  %vm42_vm1 = vcmask 64512   ;;  %v588_v6 = vmov 0.0|0.0   ;;  %s779_s0 = inlined_call_operand.vmem [shape: f32[2,8], index: 0, kind: input, shape index: {}]   ;;  %s780_s1 = inlined_call_operand.vmem [shape: f32[8,32], index: 1, kind: input, shape index: {}]   ;;  %s781_s2 = inlined_call_operand.vmem [shape: f32[1,32], index: 2, kind: input, shape index: {}]   ;;  %s782_s3 = inlined_call_operand.vmem [shape: f32[32,128], index: 3, kind: input, shape index: {}]   ;;  %s783_s4 = inlined_call_operand.vmem [shape: f32[1,128], index: 4, kind: input, shape index: {}]   ;;  %s784_s5 = inlined_call_operand.vmem [shape: f32[128,64], index: 5, kind: input, shape index: {}]   ;;  %s785_s6 = inlined_call_operand.vmem [shape: f32[1,64], index: 6, kind: input, shape index: {}]   ;;  %s786_s7 = inlined_call_operand.vmem [shape: f32[64,4], index: 7, kind: input, shape index: {}]   ;;  %s787_s8 = inlined_call_operand.vmem [shape: f32[1,4], index: 8, kind: input, shape index: {}]   ;;  %s788_s9 = inlined_call_operand.hbm [shape: f32[2,4], index: 9, kind: output, shape index: {}]  }
   0x1   :  { %v34_v0 = vld [vmem:[%s780_s1] sm:$0xff]  ;;  %444 = vmatprep.subr.mxu1 %v586_v2  ;;  %446 = vmatprep.mubr.msk.f32.mxu1 %vm587_vm0, %v586_v2  ;;  %v118_v4 = vld [vmem:[%s782_s3 + $0x8] sm:$0xff]  ;;  %v119_v7 = vld [vmem:[%s782_s3 + $0x10] sm:$0xff]  ;;  %vm128_vm2 = vcmask 261120   ;;  %vm312_vm3 = vcmask 523264   ;;  %vm386_vm4 = vcmask 31744  }
   0x2   :  { %v33_v1 = vld [vmem:[%s779_s0] sm:$0xff]  ;;  %445 = vmatpush3.msra.mxu1 %v34_v0  ;;  %520 = vmatprep.subr.bf16.mxu0 %v588_v6  ;;  %v120_v8 = vld [vmem:[%s782_s3 + $0x18] sm:$0xff]  ;;  %v204_v11 = vld [vmem:[%s784_s5 + $0x8] sm:$0xff] }
   0x3   :  { %v117_v3 = vld [vmem:[%s782_s3] sm:$0xff]  ;;  %447 = vmatmul.mubr.msk.f32.vlgmr.msra.gmra.mrb[0].mxu1 %vm42_vm1, %v33_v1  ;;  %514 = vmatprep.subr.bf16.mxu1 %v588_v6  ;;  %v518_v9 = vpack.c.bf16 %v120_v8, %v119_v7  ;;  %v205_v12 = vld [vmem:[%s784_s5 + $0x10] sm:$0xff]  ;;  %v206_v14 = vld [vmem:[%s784_s5 + $0x18] sm:$0xff] }
   0x4   :  { %v515_v5 = vpack.c.bf16 %v118_v4, %v117_v3  ;;  %457 = vmatprep.mubr.msk.f32.mxu1 %vm587_vm0, %v586_v2  ;;  %492 = vmatprep.mubr.msk.f32.mxu0 %vm587_vm0, %v586_v2  ;;  %v203_v10 = vld [vmem:[%s784_s5] sm:$0xff]  ;;  %v524_v15 = vpack.c.bf16 %v206_v14, %v205_v12  ;;  %v208_v17 = vld [vmem:[%s784_s5 + $0x28] sm:$0xff]  ;;  %v209_v19 = vld [vmem:[%s784_s5 + $0x30] sm:$0xff] }
   0x5   :  { %v521_v13 = vpack.c.bf16 %v204_v11, %v203_v10  ;;  %v207_v16 = vld [vmem:[%s784_s5 + $0x20] sm:$0xff]  ;;  %v210_v20 = vld [vmem:[%s784_s5 + $0x38] sm:$0xff]  ;;  %v212_v23 = vld [vmem:[%s784_s5 + $0x48] sm:$0xff] }
   0x6   :  { %516 = vmatpush3.bf16.msra.mxu1 %v515_v5  ;;  %v527_v18 = vpack.c.bf16 %v208_v17, %v207_v16  ;;  %v530_v21 = vpack.c.bf16 %v210_v20, %v209_v19  ;;  %v211_v22 = vld [vmem:[%s784_s5 + $0x40] sm:$0xff]  ;;  %v213_v25 = vld [vmem:[%s784_s5 + $0x50] sm:$0xff]  ;;  %v214_v26 = vld [vmem:[%s784_s5 + $0x58] sm:$0xff] }
   0x7   :  { %517 = vmatprep.subr.bf16.mxu1 %v588_v6  ;;  %522 = vmatpush3.bf16.msra.mxu0 %v521_v13  ;;  %v533_v24 = vpack.c.bf16 %v212_v23, %v211_v22  ;;  %v536_v27 = vpack.c.bf16 %v214_v26, %v213_v25  ;;  %v215_v28 = vld [vmem:[%s784_s5 + $0x60] sm:$0xff]  ;;  %v216_v29 = vld [vmem:[%s784_s5 + $0x68] sm:$0xff]  ;;  %v217_v36 = vld [vmem:[%s784_s5 + $0x70] sm:$0xff] }
   0x8   :  { %523 = vmatprep.subr.bf16.mxu0 %v588_v6  ;;  %v539_v30 = vpack.c.bf16 %v216_v29, %v215_v28  ;;  %v404_v31 = vld [vmem:[%s781_s2] ss:$0 sm:$0xff]  ;;  %v218_v37 = vld [vmem:[%s784_s5 + $0x78] sm:$0xff]  ;;  %v298_v40 = vld [vmem:[%s786_s7 + $0x8] sm:$0xff] }
   0x9   :  { %v542_v38 = vpack.c.bf16 %v218_v37, %v217_v36  ;;  %v297_v39 = vld [vmem:[%s786_s7] sm:$0xff]  ;;  %v299_v41 = vld [vmem:[%s786_s7 + $0x10] sm:$0xff]  ;;  %v300_v43 = vld [vmem:[%s786_s7 + $0x18] sm:$0xff] }
   0xa   :  { %519 = vmatpush3.bf16.msra.mxu1 %v518_v9  ;;  %v545_v42 = vpack.c.bf16 %v298_v40, %v297_v39  ;;  %v548_v44 = vpack.c.bf16 %v300_v43, %v299_v41  ;;  %v301_v45 = vld [vmem:[%s786_s7 + $0x20] sm:$0xff]  ;;  %v302_v46 = vld [vmem:[%s786_s7 + $0x28] sm:$0xff]  ;;  %v303_v53 = vld [vmem:[%s786_s7 + $0x30] sm:$0xff] }
   0xb   :  { %544 = vmatprep.subr.bf16.mxu1 %v588_v6  ;;  %525 = vmatpush3.bf16.msra.mxu0 %v524_v15  ;;  %v551_v47 = vpack.c.bf16 %v302_v46, %v301_v45  ;;  %v406_v48 = vld [vmem:[%s783_s4] ss:$0 sm:$0xff]  ;;  %v304_v54 = vld [vmem:[%s786_s7 + $0x38] sm:$0xff] }
   0xc   :  { %526 = vmatprep.subr.bf16.mxu0 %v588_v6  ;;  %v554_v55 = vpack.c.bf16 %v304_v54, %v303_v53  ;;  %v408_v56 = vld [vmem:[%s785_s6] ss:$0 sm:$0xff] }
   0xd   :  { %v409_v61 = vld [vmem:[%s787_s8] ss:$0 sm:$0xff] }
   0xf   :  { %528 = vmatpush3.bf16.msra.mxu0 %v527_v18 }
  0x10   :  { %529 = vmatprep.subr.bf16.mxu0 %v588_v6 }
  0x13   :  { %531 = vmatpush3.bf16.msra.mxu0 %v530_v21 }
  0x14   :  { %532 = vmatprep.subr.bf16.mxu0 %v588_v6 }
  0x17   :  { %534 = vmatpush3.bf16.msra.mxu0 %v533_v24 }
  0x18   :  { %535 = vmatprep.subr.bf16.mxu0 %v588_v6 }
  0x1b   :  { %537 = vmatpush3.bf16.msra.mxu0 %v536_v27 }
  0x1c   :  { %538 = vmatprep.subr.bf16.mxu0 %v588_v6 }
  0x1f   :  { %540 = vmatpush3.bf16.msra.mxu0 %v539_v30 }
  0x20   :  { %541 = vmatprep.subr.bf16.mxu0 %v588_v6 }
  0x23   :  { %543 = vmatpush3.bf16.msra.mxu0 %v542_v38 }
  0xd6   :  { %v112_v32 = vpop.f32.mrb[0].mxu1 }
  0xd7   :  { %v113_v33 = vadd.f32 %v404_v31, %v112_v32  ;;  %v448_v34 = vpop.f32.mrb[1].mxu1 }
  0xd9   :  { %v116_v35 = vmax.f32 %v113_v33, 0.0 }
  0xdb   :  { %458 = vmatmul.mubr.msk.f32.vlgmr.msra.gmra.mrb[2].mxu1 %vm128_vm2, %v116_v35 }
  0xdc   :  { %511 = vmatprep.mubr.msk.f32.mxu1 %vm587_vm0, %v586_v2  ;;  %546 = vmatpush3.bf16.msra.mxu1 %v545_v42 }
  0xdd   :  { %547 = vmatprep.subr.bf16.mxu1 %v588_v6 }
  0xe0   :  { %549 = vmatpush3.bf16.msra.mxu1 %v548_v44 }
  0xe1   :  { %550 = vmatprep.subr.bf16.mxu1 %v588_v6 }
  0xe4   :  { %552 = vmatpush3.bf16.msra.mxu1 %v551_v47 }
  0xe5   :  { %553 = vmatprep.subr.bf16.mxu1 %v588_v6 }
  0xe8   :  { %555 = vmatpush3.bf16.msra.mxu1 %v554_v55 }
 0x1ae   :  { %v198_v49 = vpop.f32.mrb[2].mxu1 }
 0x1af   :  { %v199_v50 = vadd.f32 %v406_v48, %v198_v49  ;;  %v459_v51 = vpop.f32.mrb[3].mxu1 }
 0x1b1   :  { %v202_v52 = vmax.f32 %v199_v50, 0.0 }
 0x1b3   :  { %493 = vmatmul.mubr.f32.vlgmr.msra.gmra.mrb[0].mxu0 %v202_v52 }
 0x286   :  { %v292_v57 = vpop.f32.mrb[0].mxu0 }
 0x287   :  { %v293_v58 = vadd.f32 %v408_v56, %v292_v57  ;;  %v494_v59 = vpop.f32.mrb[1].mxu0 }
 0x289   :  { %v296_v60 = vmax.f32 %v293_v58, 0.0 }
 0x28b   :  { %512 = vmatmul.mubr.msk.f32.vlgmr.msra.gmra.mrb[4].mxu1 %vm312_vm3, %v296_v60 }
 0x35e   :  { %v382_v62 = vpop.f32.mrb[4].mxu1 }
 0x35f   :  { %v383_v63 = vadd.f32 %v409_v61, %v382_v62  ;;  %v513_v0 = vpop.f32.mrb[5].mxu1 }
 0x361   :  { %387 = vst.msk [vmem:[#allocation2] sm:$0xff] %vm386_vm4, %v383_v63 }
 0x362   :  { %392 = vsyncadd [#allocation3], 96  ;;  %s589_s7 = smov [#allocation2]  }
 0x363   :  { %s393_s24 = sshll.u32 %s589_s7, 4  ;;  %s394_s24 = int_to_ptr.vmem [resolvable:$true] %s393_s24 }
 0x364   :  { %s562_s6 = scalar_lea.vmem %s394_s24, 32  ;;  %s566_s25 = scalar_lea.vmem %s394_s24, 128 }
 0x365   :  { %p563_p0 = scmp.ne.s32.totalorder %s394_s24, %s562_s6  ;;  %p567_p1 = scmp.lt.s32.totalorder %s394_s24, %s394_s24 }
 0x366   :  { %p568_p2 = scmp.lt.s32.totalorder %s566_s25, %s562_s6 }
 0x368   :  { %p569_p3 = por %p568_p2, %p567_p1 }
 0x36a   :  { %p570_p4 = pnand %p569_p3, %p563_p0 }
 0x36c   :  { %573 = shalt.err (!%p570_p4)
}
 0x36d   :  { %s574_s8 = scalar_lea.hbm %s788_s9, 32 }
 0x36e   :  { %p575_p5 = scmp.ne.s32.totalorder %s788_s9, %s574_s8  ;;  %p578_p6 = scmp.lt.u32.totalorder %s574_s8, %s788_s9 }
 0x370   :  { %p580_p7 = pnand %p578_p6, %p575_p5 }
 0x372   :  { %583 = shalt.err (!%p580_p7)
}
 0x373   :  { %s590_s30 = smov 32   ;;  %s591_s10 = smov 2  }
 0x374   :  { %399 = dma.vmem_to_hbm [thread:$0]  %s394_s24, 32, %s788_s9, [#allocation3], %s590_s30, %s590_s30, %s591_s10  }
 0x375   :  { %584 = dma.done.wait [#allocation3], 128  }
 0x376   :  { %585 = vsyncadd [#allocation3], 4294967168 }
 0x377   :  { %403 = vsyncpa [#allocation3], 1 }

</bundles_post_ra>
